<compile_context>
chip_gen: v7x
topology: tpu7x:2x2x1
jax: 0.10.0
libtpu: 0.0.40
codegen_flags: <defaults>
</compile_context>

<pallas_src>
import functools

import numpy as np
import jax
import jax.numpy as jnp
from jax.experimental import pallas as pl
from jax.experimental.pallas import tpu as pltpu

_LANES = 128
# 2048 rows * 128 lanes * 4 B = 1 MiB per output block (2 MiB double-buffered).
_MAX_BLOCK_ROWS = 2048


def _round_up(n, m):
    return ((n + m - 1) // m) * m


def _gen_labels_kernel(class_vals_ref, cum_counts_ref, out_ref):
    """Expand a class distribution into a dense, sublane-packed label slab.

    class_vals_ref : SMEM (C,) int32  -- class label values
    cum_counts_ref : SMEM (C,) int32  -- inclusive cumulative counts
    out_ref        : VMEM (block_rows, 128) int32
    """
    num_classes = class_vals_ref.shape[0]
    br, lanes = out_ref.shape
    # Global flattened position of every element in this block.
    base = pl.program_id(0) * (br * lanes)
    row = jax.lax.broadcasted_iota(jnp.int32, (br, lanes), 0)
    lane = jax.lax.broadcasted_iota(jnp.int32, (br, lanes), 1)
    idx = base + row * lanes + lane

    # Delta-sum accumulation (VPU only): ~3 VALU ops per class, single
    # accumulator vreg; scalar deltas/thresholds read from SMEM.
    # TODO(synk): for very large class counts (>=32) a log-C binary search
    # over a lane-broadcast cum_counts vector would shorten the VALU chain.
    lab = jnp.full((br, lanes), class_vals_ref[0], dtype=jnp.int32)
    for c in range(1, num_classes):  # tiny static loop over classes
        start = cum_counts_ref[c - 1]                       # scalar (SMEM)
        delta = class_vals_ref[c] - class_vals_ref[c - 1]   # scalar (SMEM)
        lab = lab + jnp.where(idx >= start, delta, 0)
    out_ref[...] = lab


@functools.partial(jax.jit, static_argnums=(2, 3, 4))
def _generate_labels_padded(class_vals, cum_counts, rows, block_rows, grid):
    """Run the generation kernel once.  Returns the (rows, 128) int32 slab.

    jit-cached on (rows, block_rows, grid, num_classes): `rows` is a
    power-of-two bucket, so the Mosaic executable is reused across Labels
    instances with similar sizes.
    """
    return pl.pallas_call(
        _gen_labels_kernel,
        out_shape=jax.ShapeDtypeStruct((rows, _LANES), jnp.int32),
        grid=(grid,),
        in_specs=[
            pl.BlockSpec(memory_space=pltpu.MemorySpace.SMEM),
            pl.BlockSpec(memory_space=pltpu.MemorySpace.SMEM),
        ],
        out_specs=pl.BlockSpec((block_rows, _LANES), lambda i: (i, 0)),
        compiler_params=pltpu.CompilerParams(
            dimension_semantics=("parallel",)),
    )(class_vals, cum_counts)


@functools.partial(jax.jit, static_argnums=(1,))
def _finalize_labels(padded, n):
    """Single jitted device op: flatten the padded slab and slice to length n."""
    return padded.reshape(-1)[:n]


def _make_labels(class_vals, counts):
    """Host-side planning + one kernel launch; returns the 1-D label vector."""
    counts_np = np.asarray(counts, dtype=np.int64)
    cum_counts = np.cumsum(counts_np)
    n = int(cum_counts[-1])
    assert n < 2**31, "label count must fit in int32 indexing"

    rows_needed = max(_round_up(pl.cdiv(n, _LANES), 8), 8)
    # Bucketize: power-of-two rows -> small set of compiled signatures, and
    # block_rows (also a power of two) always divides rows exactly.
    rows = pl.next_power_of_2(rows_needed)
    block_rows = min(rows, _MAX_BLOCK_ROWS)
    grid = rows // block_rows   # >= 2 for rows >= 4096 -> both v7x TCs active

    padded = _generate_labels_padded(
        jnp.asarray(class_vals, dtype=jnp.int32),
        jnp.asarray(cum_counts.astype(np.int32)),
        rows, block_rows, grid)                 # (rows, 128) slab
    # One jitted device op; padding past n is discarded here and must never
    # be read from the slab directly.
    labels = _finalize_labels(padded, n)
    return labels, n


class Labels:
    """JAX/Pallas port of prototorch Labels: holds a label buffer; forward
    returns it (zero-cost buffer return, exactly like `return self._labels`)."""

    def __init__(self, distribution):
        # Same distribution conventions as prototorch:
        #   dict  {class_value: count}
        #   list/tuple of counts -> classes 0..len-1
        if isinstance(distribution, dict):
            class_vals = [int(k) for k in distribution.keys()]
            counts = [int(v) for v in distribution.values()]
        else:
            class_vals = list(range(len(distribution)))
            counts = [int(c) for c in distribution]

        n = int(sum(counts))
        if n == 0:
            # explicit guard for an empty distribution
            self._labels = jnp.zeros((0,), dtype=jnp.int32)
            self._num_labels = 0
            return

        self._labels, self._num_labels = _make_labels(class_vals, counts)

    @property
    def labels(self):
        return self._labels

    @property
    def num_labels(self):
        return self._num_labels

    def __len__(self):
        return self._num_labels

    def forward(self):
        """Simply return the labels (buffer return, no kernel launch)."""
        return self._labels


if __name__ == "__main__":
    # The label initializer is deterministic; the PRNG key only anchors
    # determinism of the script.
    key = jax.random.PRNGKey(0)
    del key

    # --- case 1: small dict distribution (contiguous class values) ---
    dist1 = {0: 3, 1: 2, 2: 4}
    m1 = Labels(dist1)
    out1 = jax.block_until_ready(m1.forward())
    exp1 = np.repeat(np.array(list(dist1.keys()), dtype=np.int32),
                     np.array(list(dist1.values())))
    assert out1.dtype == jnp.int32
    assert out1.shape == exp1.shape, (out1.shape, exp1.shape)
    assert np.array_equal(np.asarray(out1), exp1), (out1, exp1)
    assert len(m1) == exp1.shape[0]

    # --- case 2: non-contiguous class values, includes a zero-count class ---
    dist2 = {5: 4, 9: 0, 2: 7, 11: 3}
    m2 = Labels(dist2)
    out2 = jax.block_until_ready(m2.forward())
    exp2 = np.repeat(np.array(list(dist2.keys()), dtype=np.int32),
                     np.array(list(dist2.values())))
    assert np.array_equal(np.asarray(out2), exp2), (out2, exp2)

    # --- case 3: list-of-counts convention, spans multiple sublane rows ---
    dist3 = [400, 300, 500, 257]  # N = 1457 -> multi-row slab
    m3 = Labels(dist3)
    out3 = jax.block_until_ready(m3.forward())
    exp3 = np.repeat(np.arange(len(dist3), dtype=np.int32),
                     np.array(dist3))
    assert out3.shape == exp3.shape
    assert np.array_equal(np.asarray(out3), exp3)

    # --- case 4: same class count / same rows bucket as case 3 ->
    #             the jitted pallas_call executable is reused (no recompile) ---
    dist4 = [100, 900, 250, 300]  # N = 1550, also bucketizes to rows=16
    m4 = Labels(dist4)
    out4 = jax.block_until_ready(m4.forward())
    exp4 = np.repeat(np.arange(len(dist4), dtype=np.int32),
                     np.array(dist4))
    assert np.array_equal(np.asarray(out4), exp4)

    print("KERNEL_OK")
</pallas_src>

<mosaic_0001>
module attributes {stable_mosaic.version = 11 : i64} {
  func.func @_gen_labels_kernel(%arg0: i32, %arg1: memref<3xi32, #tpu.memory_space<smem>>, %arg2: memref<3xi32, #tpu.memory_space<smem>>, %arg3: memref<8x128xi32, #tpu.memory_space<vmem>>) attributes {dimension_semantics = [#tpu.dimension_semantics<parallel>], iteration_bounds = array<i64: 1>, scalar_prefetch = 0 : i64, scratch_operands = 0 : i64, tpu.core_type = #tpu.core_type<tc>, window_params = [{transform_indices = @transform_0, window_bounds = array<i64: 3>}, {transform_indices = @transform_1, window_bounds = array<i64: 3>}, {transform_indices = @transform_2, window_bounds = array<i64: 8, 128>}]} {
    %c1024_i32 = arith.constant 1024 : i32
    %0 = arith.muli %arg0, %c1024_i32 : i32
    %1 = tpu.iota {dimensions = array<i32: 0>} : vector<8x128xi32>
    %2 = tpu.iota {dimensions = array<i32: 1>} : vector<8x128xi32>
    %c128_i32 = arith.constant 128 : i32
    %3 = vector.broadcast %c128_i32 : i32 to vector<8x128xi32>
    %4 = arith.muli %1, %3 : vector<8x128xi32>
    %5 = vector.broadcast %0 : i32 to vector<8x128xi32>
    %6 = arith.addi %5, %4 : vector<8x128xi32>
    %7 = arith.addi %6, %2 : vector<8x128xi32>
    %c0 = arith.constant 0 : index
    %8 = memref.load %arg1[%c0] : memref<3xi32, #tpu.memory_space<smem>>
    %9 = vector.broadcast %8 : i32 to vector<8x128xi32>
    %c0_0 = arith.constant 0 : index
    %10 = memref.load %arg2[%c0_0] : memref<3xi32, #tpu.memory_space<smem>>
    %c1 = arith.constant 1 : index
    %11 = memref.load %arg1[%c1] : memref<3xi32, #tpu.memory_space<smem>>
    %c0_1 = arith.constant 0 : index
    %12 = memref.load %arg1[%c0_1] : memref<3xi32, #tpu.memory_space<smem>>
    %13 = arith.subi %11, %12 : i32
    %14 = vector.broadcast %10 : i32 to vector<8x128xi32>
    %15 = arith.cmpi sge, %7, %14 : vector<8x128xi32>
    %c0_i32 = arith.constant 0 : i32
    %16 = vector.broadcast %13 : i32 to vector<8x128xi32>
    %17 = vector.broadcast %c0_i32 : i32 to vector<8x128xi32>
    %18 = arith.select %15, %16, %17 : vector<8x128xi1>, vector<8x128xi32>
    %19 = arith.addi %9, %18 : vector<8x128xi32>
    %c1_2 = arith.constant 1 : index
    %20 = memref.load %arg2[%c1_2] : memref<3xi32, #tpu.memory_space<smem>>
    %c2 = arith.constant 2 : index
    %21 = memref.load %arg1[%c2] : memref<3xi32, #tpu.memory_space<smem>>
    %c1_3 = arith.constant 1 : index
    %22 = memref.load %arg1[%c1_3] : memref<3xi32, #tpu.memory_space<smem>>
    %23 = arith.subi %21, %22 : i32
    %24 = vector.broadcast %20 : i32 to vector<8x128xi32>
    %25 = arith.cmpi sge, %7, %24 : vector<8x128xi32>
    %c0_i32_4 = arith.constant 0 : i32
    %26 = vector.broadcast %23 : i32 to vector<8x128xi32>
    %27 = vector.broadcast %c0_i32_4 : i32 to vector<8x128xi32>
    %28 = arith.select %25, %26, %27 : vector<8x128xi1>, vector<8x128xi32>
    %29 = arith.addi %19, %28 : vector<8x128xi32>
    %c0_5 = arith.constant 0 : index
    %c0_6 = arith.constant 0 : index
    %30 = vector.load %arg3[%c0_5, %c0_6] : memref<8x128xi32, #tpu.memory_space<vmem>>, vector<8x128xi32>
    tpu.vector_store %arg3[%c0_5, %c0_6], %29 {strides = array<i32>} : memref<8x128xi32, #tpu.memory_space<vmem>>, vector<8x128xi32>,
    return
  }
  func.func @transform_0(%arg0: i32) -> i32 {
    %c0_i32 = arith.constant 0 : i32
    %c0_i32_0 = arith.constant 0 : i32
    return %c0_i32 : i32
  }
  func.func @transform_1(%arg0: i32) -> i32 {
    %c0_i32 = arith.constant 0 : i32
    %c0_i32_0 = arith.constant 0 : i32
    return %c0_i32 : i32
  }
  func.func @transform_2(%arg0: i32) -> (i32, i32) {
    %c0_i32 = arith.constant 0 : i32
    %c0_i32_0 = arith.constant 0 : i32
    return %arg0, %c0_i32 : i32, i32
  }
}

</mosaic_0001>

<bundles_post_ra>
// kernel: _generate_labels_padded.1
= control target key start
LH: loop header
LB: loop body
LE: loop exit
PB: predicated region body
PF: predicated region fallthrough
CT: control target
= control target key end

     0   :  { %7 = vsyncpa [#allocation4], 0  ;;  %s180_s0 = inlined_call_operand.hbm [shape: s32[3], index: 0, kind: input, shape index: {}]   ;;  %s181_s1 = inlined_call_operand.vmem [shape: s32[3], index: 1, kind: input, shape index: {}]   ;;  %s182_s2 = inlined_call_operand.hbm [shape: s32[8,128], index: 2, kind: output, shape index: {}]  }
   0x1   :  { %8 = vsyncpa [#allocation5], 0 }
   0x2   :  { %9 = vsyncpa [#allocation3], 0  ;;  %s24_s11 = sshll.u32 %s181_s1, 4  ;;  %s85_s14 = scalar_lea.hbm %s180_s0, 16  ;;  %s25_s11 = int_to_ptr.vmem [resolvable:$true] %s24_s11 }
   0x3   :  { %p86_p0 = scmp.ne.s32.totalorder %s180_s0, %s85_s14  ;;  %p89_p1 = scmp.lt.u32.totalorder %s85_s14, %s180_s0 }
   0x5   :  { %p91_p2 = pnand %p89_p1, %p86_p0 }
   0x7   :  { %94 = shalt.err (!%p91_p2)
}
   0x8   :  { %s135_s19 = smov [#allocation2]   ;;  %s95_s1 = scalar_lea.vmem %s25_s11, 16 }
   0x9   :  { %17 = dma.hbm_to_smem %s180_s0, 16, %s135_s19, [#allocation4]  }
   0xa   :  { %p96_p3 = scmp.ne.s32.totalorder %s25_s11, %s95_s1  ;;  %p100_p4 = scmp.lt.s32.totalorder %s25_s11, %s25_s11 }
   0xb   :  { %p101_p5 = scmp.lt.s32.totalorder %s95_s1, %s95_s1 }
   0xd   :  { %p102_p6 = por %p101_p5, %p100_p4 }
   0xf   :  { %p103_p7 = pnand %p102_p6, %p96_p3 }
  0x11   :  { %106 = shalt.err (!%p103_p7)
}
  0x12   :  { %s136_s22 = smov [#allocation6]  }
  0x13   :  { %27 = dma.vmem_to_smem %s25_s11, 16, %s136_s22, [#allocation5]  }
  0x14   :  { %129 = dma.done.wait [#allocation4], 16  }
  0x15   :  { %130 = vsyncadd [#allocation4], 4294967280 }
  0x16   :  { %131 = dma.done.wait [#allocation5], 16  }
  0x17   :  { %132 = vsyncadd [#allocation5], 4294967280 }
  0x18   :  { %34 = sfence }
  0x19   :  { %v36_v0 = vlaneseq  ;;  %s44_s23 = sld [smem:[#allocation2]]  ;;  %s79_s25 = sld [smem:[#allocation2 + $0x1]] }
  0x1a   :  { %s46_s24 = sld [smem:[#allocation6]]  ;;  %s80_s0 = sld [smem:[#allocation6 + $0x1]] }
  0x1b   :  { %v37_v1 = vshrl.u32 %v36_v0, 7  ;;  %v39_v2 = vand.u32 127, %v36_v0  ;;  %s81_s26 = sld [smem:[#allocation2 + $0x2]]  ;;  %s137_s29 = smov [#allocation7]  }
  0x1c   :  { %s69_s30 = sshll.u32 %s137_s29, 4  ;;  %s70_s30 = int_to_ptr.vmem [resolvable:$true] %s69_s30 }
  0x1d   :  { %v40_v3 = vmul.u32 128, %v37_v1  ;;  %s107_s3 = scalar_lea.vmem %s70_s30, 128  ;;  %p112_p9 = scmp.lt.s32.totalorder %s70_s30, %s70_s30 }
  0x1e   :  { %p108_p8 = scmp.ne.s32.totalorder %s70_s30, %s107_s3  ;;  %p113_p10 = scmp.lt.s32.totalorder %s107_s3, %s107_s3 }
  0x1f   :  { %v43_v4 = vadd.s32 %v40_v3, %v39_v2  ;;  %v45_v6 = vstv %s44_s23  ;;  %s48_s27 = ssub.s32 %s79_s25, %s44_s23 }
  0x20   :  { %v49_v5 = vstv %s46_s24  ;;  %v57_v7 = vstv %s80_s0  ;;  %v51_v8 = vstv %s48_s27  ;;  %p114_p11 = por %p113_p10, %p112_p9 }
  0x21   :  { %vm50_vm0 = vcmp.ge.s32.totalorder %v43_v4, %v49_v5  ;;  %s56_s28 = ssub.s32 %s81_s26, %s79_s25  ;;  %vm58_vm1 = vcmp.ge.s32.totalorder %v43_v4, %v57_v7 }
  0x22   :  { %v52_v9 = vsel %vm50_vm0, %v51_v8, 0  ;;  %v59_v10 = vstv %s56_s28  ;;  %p115_p12 = pnand %p114_p11, %p108_p8 }
  0x23   :  { %v53_v11 = vadd.s32 %v52_v9, %v45_v6  ;;  %v60_v12 = vsel %vm58_vm1, %v59_v10, 0 }
  0x25   :  { %v61_v13 = vadd.s32 %v60_v12, %v53_v11 }
  0x27   :  { %62 = vst [vmem:[#allocation7] sm:$0xff] %v61_v13 }
  0x28   :  { %118 = shalt.err (!%p115_p12)
}
  0x29   :  { %s119_s6 = scalar_lea.hbm %s182_s2, 128 }
  0x2a   :  { %p120_p13 = scmp.ne.s32.totalorder %s182_s2, %s119_s6  ;;  %p123_p0 = scmp.lt.u32.totalorder %s119_s6, %s182_s2 }
  0x2c   :  { %p125_p1 = pnand %p123_p0, %p120_p13 }
  0x2e   :  { %128 = shalt.err (!%p125_p1)
}
  0x2f   :  { %72 = dma.vmem_to_hbm [thread:$0]  %s70_s30, 128, %s182_s2, [#allocation3]  }
  0x30   :  { %133 = dma.done.wait [#allocation3], 128  }
  0x31   :  { %134 = vsyncadd [#allocation3], 4294967168 }
  0x32   :  { %76 = vsyncpa [#allocation3], 1 }
  0x33   :  { %77 = vsyncpa [#allocation4], 1 }
  0x34   :  { %78 = vsyncpa [#allocation5], 1 }

</bundles_post_ra>
